<compile_context>
chip_gen: v7x
topology: tpu7x:2x2x1
jax: 0.10.0
libtpu: 0.0.40
codegen_flags: <defaults>
</compile_context>

<pallas_src>
import functools
import math

import jax
import jax.numpy as jnp
from jax import lax
from jax.experimental import pallas as pl
from jax.experimental.pallas import tpu as pltpu

MRG = 0.1
ALPHA = 32.0
TEMPERATURE = 1.0
GAMMA = 1.0 / 120.0          # forward() overrides self.gamma = 1/120
NEG_FILL = -1e30             # identity for the running max (all cosines are >= -1)


def _round_up(x, m):
    return ((x + m - 1) // m) * m


def _multi_proxy_loss_kernel(nb_classes, num_proxies,
                             lab_ref, x_ref, p_ref,
                             out_ref,
                             pn_ref, psum_ref, nsum_ref, cnt_ref, maxnn_ref):
    C = nb_classes
    K = num_proxies
    b = pl.program_id(0)
    last = pl.num_programs(0) - 1

    # ---- one-time init: normalize proxies (hoisted out of the batch loop) ----
    @pl.when(b == 0)
    def _init():
        p = p_ref[...].astype(jnp.float32)                     # (K, C, E)
        sq_p = jnp.sum(p * p, axis=-1, keepdims=True)          # (K, C, 1)
        pn_ref[...] = p * lax.rsqrt(sq_p + 1e-12)              # l2_norm(P)
        psum_ref[...] = jnp.zeros((1, C), jnp.float32)
        nsum_ref[...] = jnp.zeros((1, C), jnp.float32)
        cnt_ref[...] = jnp.zeros((1, C), jnp.float32)
        maxnn_ref[...] = jnp.full((K, C), NEG_FILL, jnp.float32)
        out_ref[0, 0] = 0.0

    # ---- per-batch-tile work ----
    x = x_ref[...].astype(jnp.float32)                         # (TB, E)
    sq_x = jnp.sum(x * x, axis=-1, keepdims=True)
    xn = x * lax.rsqrt(sq_x + 1e-12)                           # l2_norm(X)

    lab = lab_ref[...]                                         # (TB, 1) int32
    valid = lab >= 0                                           # padded rows carry -1
    tb = x.shape[0]
    class_ids = lax.broadcasted_iota(jnp.int32, (tb, C), 1)
    one_hot = lab == class_ids                                 # (TB, C) bool

    # cos similarity per proxy slot k: (TB, C) each, f32 accumulation on the MXU.
    cos = []
    for k in range(K):
        pk = pn_ref[k]                                         # (C, E)
        cos.append(lax.dot_general(xn, pk, (((1,), (1,)), ((), ())),
                                   preferred_element_type=jnp.float32))

    # softmax "confidence" over the K proxies of every class.
    exps = [jnp.exp(c * (1.0 / TEMPERATURE)) for c in cos]
    denom = exps[0]
    for k in range(1, K):
        denom = denom + exps[k]
    inv_denom = 1.0 / denom
    conf = [e * inv_denom for e in exps]

    # positive branch: exp(-alpha * (where(conf > gamma, sim, 0) - mrg)), mean over K
    pos_exp = None
    for k in range(K):
        v = jnp.where(conf[k] > GAMMA, cos[k], 0.0)
        v = jnp.exp(-ALPHA * (v - MRG))
        pos_exp = v if pos_exp is None else pos_exp + v
    pos_exp = pos_exp * (1.0 / K)                              # (TB, C)

    # max over K of the "non-positive" similarities
    max_np = None
    for k in range(K):
        v = jnp.where(conf[k] <= GAMMA, cos[k], 0.0)
        max_np = v if max_np is None else jnp.maximum(max_np, v)

    # negative branch: exp(alpha * (where(sim > max_np, sim, 0) - mrg)), mean over K
    neg_exp = None
    for k in range(K):
        v = jnp.where(cos[k] > max_np, cos[k], 0.0)
        v = jnp.exp(ALPHA * (v - MRG))
        neg_exp = v if neg_exp is None else neg_exp + v
    neg_exp = neg_exp * (1.0 / K)                              # (TB, C)

    # running max over the batch of the "non-negative" similarities, per (k, c)
    tile_max = []
    for k in range(K):
        v = jnp.where(cos[k] <= max_np, cos[k], 0.0)
        v = jnp.where(valid, v, NEG_FILL)                      # drop padded rows
        tile_max.append(jnp.max(v, axis=0, keepdims=True))     # (1, C)
    tile_max = jnp.concatenate(tile_max, axis=0)               # (K, C)
    maxnn_ref[...] = jnp.maximum(maxnn_ref[...], tile_max)

    # accumulate P_sim_sum / N_sim_sum / per-class positive counts
    psum_ref[...] += jnp.sum(jnp.where(one_hot, pos_exp, 0.0),
                             axis=0, keepdims=True)
    nsum_ref[...] += jnp.sum(
        jnp.where(jnp.logical_and(jnp.logical_not(one_hot), valid), neg_exp, 0.0),
        axis=0, keepdims=True)
    cnt_ref[...] += jnp.sum(one_hot.astype(jnp.float32), axis=0, keepdims=True)

    # ---- finalize: proxy-proxy term + log terms, only on the last batch tile ----
    @pl.when(b == last)
    def _finalize():
        maxnn = maxnn_ref[...]                                 # (K, C)
        not_diag = (lax.broadcasted_iota(jnp.int32, (C, C), 0)
                    != lax.broadcasted_iota(jnp.int32, (C, C), 1))
        inter_sum = 0.0
        for kr in range(K):
            pr = pn_ref[kr]                                    # (C, E)
            for kq in range(K):
                pq = pn_ref[kq]                                # (C, E)
                blk = lax.dot_general(pr, pq, (((1,), (1,)), ((), ())),
                                      preferred_element_type=jnp.float32)
                thr = maxnn[kq:kq + 1, :]                      # (1, C)
                m = jnp.where(blk > thr, blk, 0.0)
                if kr == kq:                                   # ~eye(C*K) mask
                    m = jnp.where(not_diag, m, 0.0)
                inter_sum = inter_sum + jnp.sum(jnp.exp(ALPHA * (m - MRG)))
        inter_term = jnp.log(1.0 + inter_sum) / C

        psum = psum_ref[...]                                   # (1, C)
        nsum = nsum_ref[...]
        cnt = cnt_ref[...]
        num_valid = jnp.sum((cnt > 0.0).astype(jnp.float32))
        num_valid = jnp.where(num_valid > 0.0, num_valid, 1.0)
        pos_term = jnp.sum(jnp.log(1.0 + psum)) / num_valid
        neg_term = jnp.sum(jnp.log(1.0 + nsum)) / C

        out_ref[0, 0] = pos_term + neg_term + inter_term


def multi_proxy_loss(x, labels, proxies, *, nb_classes, num_proxies_per_class,
                     block_b=128):
    """x: (B, E) float; labels: (B,) int; proxies: (C, K, E). Returns scalar f32."""
    B, E = x.shape
    C, K, E2 = proxies.shape
    assert C == nb_classes and K == num_proxies_per_class and E2 == E
    # TODO(synk): sklearn label_binarize collapses to one column when nb_classes == 2;
    #             this kernel assumes standard one-hot semantics (nb_classes > 2).

    # Zero-pad the embedding dim to a multiple of 128 lanes (no effect on norms/dots).
    e_pad = _round_up(E, 128)
    if e_pad != E:
        x = jnp.pad(x, ((0, 0), (0, e_pad - E)))
        proxies = jnp.pad(proxies, ((0, 0), (0, 0), (0, e_pad - E)))

    # (K, C, E) layout: per-proxy-slot slices are contiguous rows (no in-kernel reshape).
    p_kce = jnp.transpose(proxies, (1, 0, 2))

    # Pad batch to a multiple of the tile; padded rows get label -1 and are masked out.
    tb = block_b if B >= block_b else _round_up(B, 8)
    b_pad = _round_up(B, tb)
    if b_pad != B:
        x = jnp.pad(x, ((0, b_pad - B), (0, 0)))
    lab = jnp.full((b_pad, 1), -1, jnp.int32).at[:B, 0].set(labels.astype(jnp.int32))

    kernel = functools.partial(_multi_proxy_loss_kernel, nb_classes,
                               num_proxies_per_class)
    out = pl.pallas_call(
        kernel,
        out_shape=jax.ShapeDtypeStruct((1, 1), jnp.float32),
        grid=(b_pad // tb,),
        in_specs=[
            pl.BlockSpec((tb, 1), lambda b: (b, 0)),            # labels tile
            pl.BlockSpec((tb, e_pad), lambda b: (b, 0)),        # embeddings tile
            pl.BlockSpec((K, C, e_pad), lambda b: (0, 0, 0)),   # proxies (resident)
        ],
        out_specs=pl.BlockSpec((1, 1), lambda b: (0, 0), memory_space=pltpu.SMEM),
        scratch_shapes=[
            pltpu.VMEM((K, C, e_pad), jnp.float32),   # normalized proxies
            pltpu.VMEM((1, C), jnp.float32),          # P_sim_sum accumulator
            pltpu.VMEM((1, C), jnp.float32),          # N_sim_sum accumulator
            pltpu.VMEM((1, C), jnp.float32),          # per-class positive counts
            pltpu.VMEM((K, C), jnp.float32),          # running max of non-neg sims
        ],
        compiler_params=pltpu.CompilerParams(
            dimension_semantics=("arbitrary",)),      # batch axis is a reduction
    )(lab, x, p_kce)
    return out[0, 0]


def _reference_multi_proxy_loss(x, labels, proxies):
    """Pure-JAX transcription of the PyTorch forward (for validation)."""
    C, K, E = proxies.shape

    def l2n(v):
        return v * lax.rsqrt(jnp.sum(v * v, axis=1, keepdims=True) + 1e-12)

    P = proxies.reshape(C * K, E)
    cos = jnp.dot(l2n(x), l2n(P).T, precision=lax.Precision.HIGHEST)
    sim = cos.reshape(-1, C, K)
    conf = jnp.exp(sim / TEMPERATURE)
    conf = conf / jnp.sum(conf, axis=2, keepdims=True)

    pos = jnp.exp(-ALPHA * (jnp.where(conf > GAMMA, sim, 0.0) - MRG))
    pos_exp = jnp.mean(pos, axis=2)
    max_np = jnp.max(jnp.where(conf <= GAMMA, sim, 0.0), axis=2, keepdims=True)
    neg = jnp.exp(ALPHA * (jnp.where(sim > max_np, sim, 0.0) - MRG))
    neg_exp = jnp.mean(neg, axis=2)

    one_hot = jax.nn.one_hot(labels, C, dtype=jnp.float32)
    num_valid = jnp.sum((jnp.sum(one_hot, axis=0) != 0).astype(jnp.float32))
    num_valid = jnp.where(num_valid > 0, num_valid, 1.0)
    p_sim_sum = jnp.sum(jnp.where(one_hot == 1, pos_exp, 0.0), axis=0)
    n_sim_sum = jnp.sum(jnp.where((1.0 - one_hot) == 1, neg_exp, 0.0), axis=0)

    proxy_cos = jnp.dot(l2n(P), l2n(P).T, precision=lax.Precision.HIGHEST)
    max_nn = jnp.max(jnp.where(sim <= max_np, sim, 0.0), axis=0, keepdims=True)
    proxy_sim = jnp.where(proxy_cos.reshape(-1, C, K) > max_nn,
                          proxy_cos.reshape(-1, C, K), 0.0).reshape(-1, C * K)
    inter = proxy_sim * (1.0 - jnp.eye(C * K, dtype=jnp.float32))
    inter_term = jnp.log(1.0 + jnp.sum(jnp.exp(ALPHA * (inter - MRG)))) / C

    pos_term = jnp.sum(jnp.log(1.0 + p_sim_sum)) / num_valid
    neg_term = jnp.sum(jnp.log(1.0 + n_sim_sum)) / C
    return pos_term + neg_term + inter_term


if __name__ == "__main__":
    key = jax.random.PRNGKey(0)
    k_x, k_t, k_p = jax.random.split(key, 3)

    batch, sz_embed, nb_classes, n_proxy = 8, 32, 4, 2
    x = jax.random.normal(k_x, (batch, sz_embed), dtype=jnp.float32)
    labels = jax.random.randint(k_t, (batch,), 0, nb_classes, dtype=jnp.int32)
    # kaiming_normal_(mode='fan_out') on (C, K, E): std = sqrt(2 / (C * E))
    proxies = jax.random.normal(k_p, (nb_classes, n_proxy, sz_embed),
                                dtype=jnp.float32) * math.sqrt(
                                    2.0 / (nb_classes * sz_embed))

    loss_fn = jax.jit(functools.partial(multi_proxy_loss, nb_classes=nb_classes,
                                        num_proxies_per_class=n_proxy))
    loss = loss_fn(x, labels, proxies)
    jax.block_until_ready(loss)

    ref = _reference_multi_proxy_loss(x, labels, proxies)
    assert jnp.isfinite(loss)
    assert jnp.allclose(loss, ref, rtol=1e-2, atol=1e-3), (loss, ref)
    print("KERNEL_OK")
</pallas_src>

<mosaic_0001>
module attributes {stable_mosaic.version = 11 : i64} {
  func.func @_multi_proxy_loss_kernel(%arg0: i32, %arg1: memref<8x1xi32, #tpu.memory_space<vmem>>, %arg2: memref<8x128xf32, #tpu.memory_space<vmem>>, %arg3: memref<2x4x128xf32, #tpu.memory_space<vmem>>, %arg4: memref<1x1xf32, #tpu.memory_space<smem>>, %arg5: memref<2x4x128xf32, #tpu.memory_space<vmem>>, %arg6: memref<1x4xf32, #tpu.memory_space<vmem>>, %arg7: memref<1x4xf32, #tpu.memory_space<vmem>>, %arg8: memref<1x4xf32, #tpu.memory_space<vmem>>, %arg9: memref<2x4xf32, #tpu.memory_space<vmem>>) attributes {dimension_semantics = [#tpu.dimension_semantics<arbitrary>], iteration_bounds = array<i64: 1>, scalar_prefetch = 0 : i64, scratch_operands = 5 : i64, tpu.core_type = #tpu.core_type<tc>, window_params = [{transform_indices = @transform_0, window_bounds = array<i64: 8, 1>}, {transform_indices = @transform_1, window_bounds = array<i64: 8, 128>}, {pipeline_mode = #tpu.pipeline_mode<synchronous>, transform_indices = @transform_2, window_bounds = array<i64: 2, 4, 128>}, {transform_indices = @transform_3, window_bounds = array<i64: 1, 1>}]} {
    %c0_i32 = arith.constant 0 : i32
    %0 = arith.cmpi eq, %arg0, %c0_i32 : i32
    %1 = arith.extui %0 : i1 to i32
    %c0_i32_0 = arith.constant 0 : i32
    %2 = arith.cmpi ne, %1, %c0_i32_0 : i32
    scf.if %2 {
      %c0_66 = arith.constant 0 : index
      %c0_67 = arith.constant 0 : index
      %c0_68 = arith.constant 0 : index
      %133 = vector.load %arg3[%c0_66, %c0_67, %c0_68] : memref<2x4x128xf32, #tpu.memory_space<vmem>>, vector<2x4x128xf32>
      %134 = arith.mulf %133, %133 : vector<2x4x128xf32>
      %cst_69 = arith.constant dense<0.000000e+00> : vector<2x4xf32>
      %135 = vector.multi_reduction <add>, %134, %cst_69 [2] : vector<2x4x128xf32> to vector<2x4xf32>
      %136 = vector.shape_cast %135 : vector<2x4xf32> to vector<2x4x1xf32>
      %cst_70 = arith.constant 9.99999996E-13 : f32
      %137 = vector.broadcast %cst_70 : f32 to vector<2x4x1xf32>
      %138 = arith.addf %136, %137 : vector<2x4x1xf32>
      %139 = math.rsqrt %138 : vector<2x4x1xf32>
      %140 = vector.broadcast %139 : vector<2x4x1xf32> to vector<2x4x128xf32>
      %141 = arith.mulf %133, %140 : vector<2x4x128xf32>
      %c0_71 = arith.constant 0 : index
      %c0_72 = arith.constant 0 : index
      %c0_73 = arith.constant 0 : index
      %142 = vector.load %arg5[%c0_71, %c0_72, %c0_73] : memref<2x4x128xf32, #tpu.memory_space<vmem>>, vector<2x4x128xf32>
      tpu.vector_store %arg5[%c0_71, %c0_72, %c0_73], %141 {strides = array<i32>} : memref<2x4x128xf32, #tpu.memory_space<vmem>>, vector<2x4x128xf32>,
      %cst_74 = arith.constant 0.000000e+00 : f32
      %143 = vector.broadcast %cst_74 : f32 to vector<1x4xf32>
      %c0_75 = arith.constant 0 : index
      %c0_76 = arith.constant 0 : index
      %144 = vector.load %arg6[%c0_75, %c0_76] : memref<1x4xf32, #tpu.memory_space<vmem>>, vector<1x4xf32>
      tpu.vector_store %arg6[%c0_75, %c0_76], %143 {strides = array<i32>} : memref<1x4xf32, #tpu.memory_space<vmem>>, vector<1x4xf32>,
      %cst_77 = arith.constant 0.000000e+00 : f32
      %145 = vector.broadcast %cst_77 : f32 to vector<1x4xf32>
      %c0_78 = arith.constant 0 : index
      %c0_79 = arith.constant 0 : index
      %146 = vector.load %arg7[%c0_78, %c0_79] : memref<1x4xf32, #tpu.memory_space<vmem>>, vector<1x4xf32>
      tpu.vector_store %arg7[%c0_78, %c0_79], %145 {strides = array<i32>} : memref<1x4xf32, #tpu.memory_space<vmem>>, vector<1x4xf32>,
      %cst_80 = arith.constant 0.000000e+00 : f32
      %147 = vector.broadcast %cst_80 : f32 to vector<1x4xf32>
      %c0_81 = arith.constant 0 : index
      %c0_82 = arith.constant 0 : index
      %148 = vector.load %arg8[%c0_81, %c0_82] : memref<1x4xf32, #tpu.memory_space<vmem>>, vector<1x4xf32>
      tpu.vector_store %arg8[%c0_81, %c0_82], %147 {strides = array<i32>} : memref<1x4xf32, #tpu.memory_space<vmem>>, vector<1x4xf32>,
      %cst_83 = arith.constant -1.000000e+30 : f32
      %149 = vector.broadcast %cst_83 : f32 to vector<2x4xf32>
      %c0_84 = arith.constant 0 : index
      %c0_85 = arith.constant 0 : index
      %150 = vector.load %arg9[%c0_84, %c0_85] : memref<2x4xf32, #tpu.memory_space<vmem>>, vector<2x4xf32>
      tpu.vector_store %arg9[%c0_84, %c0_85], %149 {strides = array<i32>} : memref<2x4xf32, #tpu.memory_space<vmem>>, vector<2x4xf32>,
      %cst_86 = arith.constant 0.000000e+00 : f32
      %c0_87 = arith.constant 0 : index
      %c0_88 = arith.constant 0 : index
      %151 = memref.load %arg4[%c0_87, %c0_88] : memref<1x1xf32, #tpu.memory_space<smem>>
      memref.store %cst_86, %arg4[%c0_87, %c0_88] : memref<1x1xf32, #tpu.memory_space<smem>>
    } else {
    }
    %c0 = arith.constant 0 : index
    %c0_1 = arith.constant 0 : index
    %3 = vector.load %arg2[%c0, %c0_1] : memref<8x128xf32, #tpu.memory_space<vmem>>, vector<8x128xf32>
    %4 = arith.mulf %3, %3 : vector<8x128xf32>
    %cst = arith.constant dense<0.000000e+00> : vector<8xf32>
    %5 = vector.multi_reduction <add>, %4, %cst [1] : vector<8x128xf32> to vector<8xf32>
    %6 = vector.shape_cast %5 : vector<8xf32> to vector<8x1xf32>
    %cst_2 = arith.constant 9.99999996E-13 : f32
    %7 = vector.broadcast %cst_2 : f32 to vector<8x1xf32>
    %8 = arith.addf %6, %7 : vector<8x1xf32>
    %9 = math.rsqrt %8 : vector<8x1xf32>
    %10 = vector.broadcast %9 : vector<8x1xf32> to vector<8x128xf32>
    %11 = arith.mulf %3, %10 : vector<8x128xf32>
    %c0_3 = arith.constant 0 : index
    %c0_4 = arith.constant 0 : index
    %12 = vector.load %arg1[%c0_3, %c0_4] : memref<8x1xi32, #tpu.memory_space<vmem>>, vector<8x1xi32>
    %c0_i32_5 = arith.constant 0 : i32
    %13 = vector.broadcast %c0_i32_5 : i32 to vector<8x1xi32>
    %14 = arith.cmpi sge, %12, %13 : vector<8x1xi32>
    %15 = tpu.iota {dimensions = array<i32: 1>} : vector<8x4xi32>
    %16 = vector.broadcast %12 : vector<8x1xi32> to vector<8x4xi32>
    %17 = arith.cmpi eq, %16, %15 : vector<8x4xi32>
    %c0_6 = arith.constant 0 : index
    %c0_7 = arith.constant 0 : index
    %c0_8 = arith.constant 0 : index
    %18 = vector.load %arg5[%c0_6, %c0_7, %c0_8] : memref<2x4x128xf32, #tpu.memory_space<vmem>>, vector<1x4x128xf32>
    %19 = vector.shape_cast %18 : vector<1x4x128xf32> to vector<4x128xf32>
    %cst_9 = arith.constant dense<0.000000e+00> : vector<8x4xf32>
    %20 = tpu.matmul %11, %19, %cst_9 {dimension_numbers = #tpu.dot_dimension_numbers<[1], [1], [0], [0], [0, 0, 1, 0], [], []>} : vector<8x128xf32>, vector<4x128xf32>, vector<8x4xf32> -> vector<8x4xf32>
    %c1 = arith.constant 1 : index
    %c0_10 = arith.constant 0 : index
    %c0_11 = arith.constant 0 : index
    %21 = vector.load %arg5[%c1, %c0_10, %c0_11] : memref<2x4x128xf32, #tpu.memory_space<vmem>>, vector<1x4x128xf32>
    %22 = vector.shape_cast %21 : vector<1x4x128xf32> to vector<4x128xf32>
    %cst_12 = arith.constant dense<0.000000e+00> : vector<8x4xf32>
    %23 = tpu.matmul %11, %22, %cst_12 {dimension_numbers = #tpu.dot_dimension_numbers<[1], [1], [0], [0], [0, 0, 1, 0], [], []>} : vector<8x128xf32>, vector<4x128xf32>, vector<8x4xf32> -> vector<8x4xf32>
    %cst_13 = arith.constant 1.000000e+00 : f32
    %24 = vector.broadcast %cst_13 : f32 to vector<8x4xf32>
    %25 = arith.mulf %20, %24 : vector<8x4xf32>
    %26 = math.exp %25 : vector<8x4xf32>
    %cst_14 = arith.constant 1.000000e+00 : f32
    %27 = vector.broadcast %cst_14 : f32 to vector<8x4xf32>
    %28 = arith.mulf %23, %27 : vector<8x4xf32>
    %29 = math.exp %28 : vector<8x4xf32>
    %30 = arith.addf %26, %29 : vector<8x4xf32>
    %cst_15 = arith.constant 1.000000e+00 : f32
    %31 = vector.broadcast %cst_15 : f32 to vector<8x4xf32>
    %32 = arith.divf %31, %30 : vector<8x4xf32>
    %33 = arith.mulf %26, %32 : vector<8x4xf32>
    %34 = arith.mulf %29, %32 : vector<8x4xf32>
    %cst_16 = arith.constant 0.00833333377 : f32
    %35 = vector.broadcast %cst_16 : f32 to vector<8x4xf32>
    %36 = arith.cmpf ogt, %33, %35 : vector<8x4xf32>
    %cst_17 = arith.constant 0.000000e+00 : f32
    %37 = vector.broadcast %cst_17 : f32 to vector<8x4xf32>
    %38 = arith.select %36, %20, %37 : vector<8x4xi1>, vector<8x4xf32>
    %cst_18 = arith.constant 1.000000e-01 : f32
    %39 = vector.broadcast %cst_18 : f32 to vector<8x4xf32>
    %40 = arith.subf %38, %39 : vector<8x4xf32>
    %cst_19 = arith.constant -3.200000e+01 : f32
    %41 = vector.broadcast %cst_19 : f32 to vector<8x4xf32>
    %42 = arith.mulf %41, %40 : vector<8x4xf32>
    %43 = math.exp %42 : vector<8x4xf32>
    %cst_20 = arith.constant 0.00833333377 : f32
    %44 = vector.broadcast %cst_20 : f32 to vector<8x4xf32>
    %45 = arith.cmpf ogt, %34, %44 : vector<8x4xf32>
    %cst_21 = arith.constant 0.000000e+00 : f32
    %46 = vector.broadcast %cst_21 : f32 to vector<8x4xf32>
    %47 = arith.select %45, %23, %46 : vector<8x4xi1>, vector<8x4xf32>
    %cst_22 = arith.constant 1.000000e-01 : f32
    %48 = vector.broadcast %cst_22 : f32 to vector<8x4xf32>
    %49 = arith.subf %47, %48 : vector<8x4xf32>
    %cst_23 = arith.constant -3.200000e+01 : f32
    %50 = vector.broadcast %cst_23 : f32 to vector<8x4xf32>
    %51 = arith.mulf %50, %49 : vector<8x4xf32>
    %52 = math.exp %51 : vector<8x4xf32>
    %53 = arith.addf %43, %52 : vector<8x4xf32>
    %cst_24 = arith.constant 5.000000e-01 : f32
    %54 = vector.broadcast %cst_24 : f32 to vector<8x4xf32>
    %55 = arith.mulf %53, %54 : vector<8x4xf32>
    %cst_25 = arith.constant 0.00833333377 : f32
    %56 = vector.broadcast %cst_25 : f32 to vector<8x4xf32>
    %57 = arith.cmpf ole, %33, %56 : vector<8x4xf32>
    %cst_26 = arith.constant 0.000000e+00 : f32
    %58 = vector.broadcast %cst_26 : f32 to vector<8x4xf32>
    %59 = arith.select %57, %20, %58 : vector<8x4xi1>, vector<8x4xf32>
    %cst_27 = arith.constant 0.00833333377 : f32
    %60 = vector.broadcast %cst_27 : f32 to vector<8x4xf32>
    %61 = arith.cmpf ole, %34, %60 : vector<8x4xf32>
    %cst_28 = arith.constant 0.000000e+00 : f32
    %62 = vector.broadcast %cst_28 : f32 to vector<8x4xf32>
    %63 = arith.select %61, %23, %62 : vector<8x4xi1>, vector<8x4xf32>
    %64 = arith.maximumf %59, %63 : vector<8x4xf32>
    %65 = arith.cmpf ogt, %20, %64 : vector<8x4xf32>
    %cst_29 = arith.constant 0.000000e+00 : f32
    %66 = vector.broadcast %cst_29 : f32 to vector<8x4xf32>
    %67 = arith.select %65, %20, %66 : vector<8x4xi1>, vector<8x4xf32>
    %cst_30 = arith.constant 1.000000e-01 : f32
    %68 = vector.broadcast %cst_30 : f32 to vector<8x4xf32>
    %69 = arith.subf %67, %68 : vector<8x4xf32>
    %cst_31 = arith.constant 3.200000e+01 : f32
    %70 = vector.broadcast %cst_31 : f32 to vector<8x4xf32>
    %71 = arith.mulf %70, %69 : vector<8x4xf32>
    %72 = math.exp %71 : vector<8x4xf32>
    %73 = arith.cmpf ogt, %23, %64 : vector<8x4xf32>
    %cst_32 = arith.constant 0.000000e+00 : f32
    %74 = vector.broadcast %cst_32 : f32 to vector<8x4xf32>
    %75 = arith.select %73, %23, %74 : vector<8x4xi1>, vector<8x4xf32>
    %cst_33 = arith.constant 1.000000e-01 : f32
    %76 = vector.broadcast %cst_33 : f32 to vector<8x4xf32>
    %77 = arith.subf %75, %76 : vector<8x4xf32>
    %cst_34 = arith.constant 3.200000e+01 : f32
    %78 = vector.broadcast %cst_34 : f32 to vector<8x4xf32>
    %79 = arith.mulf %78, %77 : vector<8x4xf32>
    %80 = math.exp %79 : vector<8x4xf32>
    %81 = arith.addf %72, %80 : vector<8x4xf32>
    %cst_35 = arith.constant 5.000000e-01 : f32
    %82 = vector.broadcast %cst_35 : f32 to vector<8x4xf32>
    %83 = arith.mulf %81, %82 : vector<8x4xf32>
    %84 = arith.cmpf ole, %20, %64 : vector<8x4xf32>
    %cst_36 = arith.constant 0.000000e+00 : f32
    %85 = vector.broadcast %cst_36 : f32 to vector<8x4xf32>
    %86 = arith.select %84, %20, %85 : vector<8x4xi1>, vector<8x4xf32>
    %cst_37 = arith.constant -1.000000e+30 : f32
    %87 = vector.shape_cast %14 : vector<8x1xi1> to vector<8x1xi1>
    %88 = vector.broadcast %87 : vector<8x1xi1> to vector<8x4xi1>
    %89 = vector.broadcast %cst_37 : f32 to vector<8x4xf32>
    %90 = arith.select %88, %86, %89 : vector<8x4xi1>, vector<8x4xf32>
    %cst_38 = arith.constant dense<0xFF800000> : vector<4xf32>
    %91 = vector.multi_reduction <maximumf>, %90, %cst_38 [0] : vector<8x4xf32> to vector<4xf32>
    %92 = vector.shape_cast %91 : vector<4xf32> to vector<1x4xf32>
    %93 = arith.cmpf ole, %23, %64 : vector<8x4xf32>
    %cst_39 = arith.constant 0.000000e+00 : f32
    %94 = vector.broadcast %cst_39 : f32 to vector<8x4xf32>
    %95 = arith.select %93, %23, %94 : vector<8x4xi1>, vector<8x4xf32>
    %cst_40 = arith.constant -1.000000e+30 : f32
    %96 = vector.shape_cast %14 : vector<8x1xi1> to vector<8x1xi1>
    %97 = vector.broadcast %96 : vector<8x1xi1> to vector<8x4xi1>
    %98 = vector.broadcast %cst_40 : f32 to vector<8x4xf32>
    %99 = arith.select %97, %95, %98 : vector<8x4xi1>, vector<8x4xf32>
    %cst_41 = arith.constant dense<0xFF800000> : vector<4xf32>
    %100 = vector.multi_reduction <maximumf>, %99, %cst_41 [0] : vector<8x4xf32> to vector<4xf32>
    %101 = vector.shape_cast %100 : vector<4xf32> to vector<1x4xf32>
    %102 = tpu.concatenate %92, %101 in 0 : vector<1x4xf32>, vector<1x4xf32> -> vector<2x4xf32>
    %c0_42 = arith.constant 0 : index
    %c0_43 = arith.constant 0 : index
    %103 = vector.load %arg9[%c0_42, %c0_43] : memref<2x4xf32, #tpu.memory_space<vmem>>, vector<2x4xf32>
    %104 = arith.maximumf %103, %102 : vector<2x4xf32>
    %c0_44 = arith.constant 0 : index
    %c0_45 = arith.constant 0 : index
    %105 = vector.load %arg9[%c0_44, %c0_45] : memref<2x4xf32, #tpu.memory_space<vmem>>, vector<2x4xf32>
    tpu.vector_store %arg9[%c0_44, %c0_45], %104 {strides = array<i32>} : memref<2x4xf32, #tpu.memory_space<vmem>>, vector<2x4xf32>,
    %c0_46 = arith.constant 0 : index
    %c0_47 = arith.constant 0 : index
    %106 = vector.load %arg6[%c0_46, %c0_47] : memref<1x4xf32, #tpu.memory_space<vmem>>, vector<1x4xf32>
    %cst_48 = arith.constant 0.000000e+00 : f32
    %107 = vector.broadcast %cst_48 : f32 to vector<8x4xf32>
    %108 = arith.select %17, %55, %107 : vector<8x4xi1>, vector<8x4xf32>
    %cst_49 = arith.constant dense<0.000000e+00> : vector<4xf32>
    %109 = vector.multi_reduction <add>, %108, %cst_49 [0] : vector<8x4xf32> to vector<4xf32>
    %110 = vector.shape_cast %109 : vector<4xf32> to vector<1x4xf32>
    %111 = arith.addf %106, %110 : vector<1x4xf32>
    %c0_50 = arith.constant 0 : index
    %c0_51 = arith.constant 0 : index
    %112 = vector.load %arg6[%c0_50, %c0_51] : memref<1x4xf32, #tpu.memory_space<vmem>>, vector<1x4xf32>
    tpu.vector_store %arg6[%c0_50, %c0_51], %111 {strides = array<i32>} : memref<1x4xf32, #tpu.memory_space<vmem>>, vector<1x4xf32>,
    %c0_52 = arith.constant 0 : index
    %c0_53 = arith.constant 0 : index
    %113 = vector.load %arg7[%c0_52, %c0_53] : memref<1x4xf32, #tpu.memory_space<vmem>>, vector<1x4xf32>
    %cst_54 = arith.constant dense<true> : vector<8x4xi1>
    %114 = arith.xori %17, %cst_54 : vector<8x4xi1>
    %115 = vector.broadcast %14 : vector<8x1xi1> to vector<8x4xi1>
    %116 = arith.andi %114, %115 : vector<8x4xi1>
    %cst_55 = arith.constant 0.000000e+00 : f32
    %117 = vector.broadcast %cst_55 : f32 to vector<8x4xf32>
    %118 = arith.select %116, %83, %117 : vector<8x4xi1>, vector<8x4xf32>
    %cst_56 = arith.constant dense<0.000000e+00> : vector<4xf32>
    %119 = vector.multi_reduction <add>, %118, %cst_56 [0] : vector<8x4xf32> to vector<4xf32>
    %120 = vector.shape_cast %119 : vector<4xf32> to vector<1x4xf32>
    %121 = arith.addf %113, %120 : vector<1x4xf32>
    %c0_57 = arith.constant 0 : index
    %c0_58 = arith.constant 0 : index
    %122 = vector.load %arg7[%c0_57, %c0_58] : memref<1x4xf32, #tpu.memory_space<vmem>>, vector<1x4xf32>
    tpu.vector_store %arg7[%c0_57, %c0_58], %121 {strides = array<i32>} : memref<1x4xf32, #tpu.memory_space<vmem>>, vector<1x4xf32>,
    %c0_59 = arith.constant 0 : index
    %c0_60 = arith.constant 0 : index
    %123 = vector.load %arg8[%c0_59, %c0_60] : memref<1x4xf32, #tpu.memory_space<vmem>>, vector<1x4xf32>
    %124 = arith.extui %17 : vector<8x4xi1> to vector<8x4xi32>
    %125 = arith.sitofp %124 : vector<8x4xi32> to vector<8x4xf32>
    %cst_61 = arith.constant dense<0.000000e+00> : vector<4xf32>
    %126 = vector.multi_reduction <add>, %125, %cst_61 [0] : vector<8x4xf32> to vector<4xf32>
    %127 = vector.shape_cast %126 : vector<4xf32> to vector<1x4xf32>
    %128 = arith.addf %123, %127 : vector<1x4xf32>
    %c0_62 = arith.constant 0 : index
    %c0_63 = arith.constant 0 : index
    %129 = vector.load %arg8[%c0_62, %c0_63] : memref<1x4xf32, #tpu.memory_space<vmem>>, vector<1x4xf32>
    tpu.vector_store %arg8[%c0_62, %c0_63], %128 {strides = array<i32>} : memref<1x4xf32, #tpu.memory_space<vmem>>, vector<1x4xf32>,
    %c0_i32_64 = arith.constant 0 : i32
    %130 = arith.cmpi eq, %arg0, %c0_i32_64 : i32
    %131 = arith.extui %130 : i1 to i32
    %c0_i32_65 = arith.constant 0 : i32
    %132 = arith.cmpi ne, %131, %c0_i32_65 : i32
    scf.if %132 {
      %c0_66 = arith.constant 0 : index
      %c0_67 = arith.constant 0 : index
      %133 = vector.load %arg9[%c0_66, %c0_67] : memref<2x4xf32, #tpu.memory_space<vmem>>, vector<2x4xf32>
      %134 = tpu.iota {dimensions = array<i32: 0>} : vector<4x4xi32>
      %135 = tpu.iota {dimensions = array<i32: 1>} : vector<4x4xi32>
      %136 = arith.cmpi ne, %134, %135 : vector<4x4xi32>
      %c0_68 = arith.constant 0 : index
      %c0_69 = arith.constant 0 : index
      %c0_70 = arith.constant 0 : index
      %137 = vector.load %arg5[%c0_68, %c0_69, %c0_70] : memref<2x4x128xf32, #tpu.memory_space<vmem>>, vector<1x4x128xf32>
      %138 = vector.shape_cast %137 : vector<1x4x128xf32> to vector<4x128xf32>
      %c0_71 = arith.constant 0 : index
      %c0_72 = arith.constant 0 : index
      %c0_73 = arith.constant 0 : index
      %139 = vector.load %arg5[%c0_71, %c0_72, %c0_73] : memref<2x4x128xf32, #tpu.memory_space<vmem>>, vector<1x4x128xf32>
      %140 = vector.shape_cast %139 : vector<1x4x128xf32> to vector<4x128xf32>
      %cst_74 = arith.constant dense<0.000000e+00> : vector<4x4xf32>
      %141 = tpu.matmul %138, %140, %cst_74 {dimension_numbers = #tpu.dot_dimension_numbers<[1], [1], [0], [0], [0, 0, 1, 0], [], []>} : vector<4x128xf32>, vector<4x128xf32>, vector<4x4xf32> -> vector<4x4xf32>
      %142 = vector.extract_strided_slice %133 {offsets = [0, 0], sizes = [1, 4], strides = [1, 1]} : vector<2x4xf32> to vector<1x4xf32>
      %143 = vector.broadcast %142 : vector<1x4xf32> to vector<4x4xf32>
      %144 = arith.cmpf ogt, %141, %143 : vector<4x4xf32>
      %cst_75 = arith.constant 0.000000e+00 : f32
      %145 = vector.broadcast %cst_75 : f32 to vector<4x4xf32>
      %146 = arith.select %144, %141, %145 : vector<4x4xi1>, vector<4x4xf32>
      %cst_76 = arith.constant 0.000000e+00 : f32
      %147 = vector.broadcast %cst_76 : f32 to vector<4x4xf32>
      %148 = arith.select %136, %146, %147 : vector<4x4xi1>, vector<4x4xf32>
      %cst_77 = arith.constant 1.000000e-01 : f32
      %149 = vector.broadcast %cst_77 : f32 to vector<4x4xf32>
      %150 = arith.subf %148, %149 : vector<4x4xf32>
      %cst_78 = arith.constant 3.200000e+01 : f32
      %151 = vector.broadcast %cst_78 : f32 to vector<4x4xf32>
      %152 = arith.mulf %151, %150 : vector<4x4xf32>
      %153 = math.exp %152 : vector<4x4xf32>
      %154 = vector.shape_cast %153 : vector<4x4xf32> to vector<1x4x4xf32>
      %cst_79 = arith.constant dense<0.000000e+00> : vector<1xf32>
      %155 = vector.multi_reduction <add>, %154, %cst_79 [1, 2] : vector<1x4x4xf32> to vector<1xf32>
      %156 = vector.shape_cast %155 : vector<1xf32> to vector<1x1x1xf32>
      %157 = vector.extract %156[0, 0, 0] : f32 from vector<1x1x1xf32>
      %cst_80 = arith.constant 0.000000e+00 : f32
      %158 = arith.addf %cst_80, %157 : f32
      %c1_81 = arith.constant 1 : index
      %c0_82 = arith.constant 0 : index
      %c0_83 = arith.constant 0 : index
      %159 = vector.load %arg5[%c1_81, %c0_82, %c0_83] : memref<2x4x128xf32, #tpu.memory_space<vmem>>, vector<1x4x128xf32>
      %160 = vector.shape_cast %159 : vector<1x4x128xf32> to vector<4x128xf32>
      %cst_84 = arith.constant dense<0.000000e+00> : vector<4x4xf32>
      %161 = tpu.matmul %138, %160, %cst_84 {dimension_numbers = #tpu.dot_dimension_numbers<[1], [1], [0], [0], [0, 0, 1, 0], [], []>} : vector<4x128xf32>, vector<4x128xf32>, vector<4x4xf32> -> vector<4x4xf32>
      %162 = vector.extract_strided_slice %133 {offsets = [1, 0], sizes = [1, 4], strides = [1, 1]} : vector<2x4xf32> to vector<1x4xf32>
      %163 = vector.broadcast %162 : vector<1x4xf32> to vector<4x4xf32>
      %164 = arith.cmpf ogt, %161, %163 : vector<4x4xf32>
      %cst_85 = arith.constant 0.000000e+00 : f32
      %165 = vector.broadcast %cst_85 : f32 to vector<4x4xf32>
      %166 = arith.select %164, %161, %165 : vector<4x4xi1>, vector<4x4xf32>
      %cst_86 = arith.constant 1.000000e-01 : f32
      %167 = vector.broadcast %cst_86 : f32 to vector<4x4xf32>
      %168 = arith.subf %166, %167 : vector<4x4xf32>
      %cst_87 = arith.constant 3.200000e+01 : f32
      %169 = vector.broadcast %cst_87 : f32 to vector<4x4xf32>
      %170 = arith.mulf %169, %168 : vector<4x4xf32>
      %171 = math.exp %170 : vector<4x4xf32>
      %172 = vector.shape_cast %171 : vector<4x4xf32> to vector<1x4x4xf32>
      %cst_88 = arith.constant dense<0.000000e+00> : vector<1xf32>
      %173 = vector.multi_reduction <add>, %172, %cst_88 [1, 2] : vector<1x4x4xf32> to vector<1xf32>
      %174 = vector.shape_cast %173 : vector<1xf32> to vector<1x1x1xf32>
      %175 = vector.extract %174[0, 0, 0] : f32 from vector<1x1x1xf32>
      %176 = arith.addf %158, %175 : f32
      %c1_89 = arith.constant 1 : index
      %c0_90 = arith.constant 0 : index
      %c0_91 = arith.constant 0 : index
      %177 = vector.load %arg5[%c1_89, %c0_90, %c0_91] : memref<2x4x128xf32, #tpu.memory_space<vmem>>, vector<1x4x128xf32>
      %178 = vector.shape_cast %177 : vector<1x4x128xf32> to vector<4x128xf32>
      %c0_92 = arith.constant 0 : index
      %c0_93 = arith.constant 0 : index
      %c0_94 = arith.constant 0 : index
      %179 = vector.load %arg5[%c0_92, %c0_93, %c0_94] : memref<2x4x128xf32, #tpu.memory_space<vmem>>, vector<1x4x128xf32>
      %180 = vector.shape_cast %179 : vector<1x4x128xf32> to vector<4x128xf32>
      %cst_95 = arith.constant dense<0.000000e+00> : vector<4x4xf32>
      %181 = tpu.matmul %178, %180, %cst_95 {dimension_numbers = #tpu.dot_dimension_numbers<[1], [1], [0], [0], [0, 0, 1, 0], [], []>} : vector<4x128xf32>, vector<4x128xf32>, vector<4x4xf32> -> vector<4x4xf32>
      %182 = vector.extract_strided_slice %133 {offsets = [0, 0], sizes = [1, 4], strides = [1, 1]} : vector<2x4xf32> to vector<1x4xf32>
      %183 = vector.broadcast %182 : vector<1x4xf32> to vector<4x4xf32>
      %184 = arith.cmpf ogt, %181, %183 : vector<4x4xf32>
      %cst_96 = arith.constant 0.000000e+00 : f32
      %185 = vector.broadcast %cst_96 : f32 to vector<4x4xf32>
      %186 = arith.select %184, %181, %185 : vector<4x4xi1>, vector<4x4xf32>
      %cst_97 = arith.constant 1.000000e-01 : f32
      %187 = vector.broadcast %cst_97 : f32 to vector<4x4xf32>
      %188 = arith.subf %186, %187 : vector<4x4xf32>
      %cst_98 = arith.constant 3.200000e+01 : f32
      %189 = vector.broadcast %cst_98 : f32 to vector<4x4xf32>
      %190 = arith.mulf %189, %188 : vector<4x4xf32>
      %191 = math.exp %190 : vector<4x4xf32>
      %192 = vector.shape_cast %191 : vector<4x4xf32> to vector<1x4x4xf32>
      %cst_99 = arith.constant dense<0.000000e+00> : vector<1xf32>
      %193 = vector.multi_reduction <add>, %192, %cst_99 [1, 2] : vector<1x4x4xf32> to vector<1xf32>
      %194 = vector.shape_cast %193 : vector<1xf32> to vector<1x1x1xf32>
      %195 = vector.extract %194[0, 0, 0] : f32 from vector<1x1x1xf32>
      %196 = arith.addf %176, %195 : f32
      %c1_100 = arith.constant 1 : index
      %c0_101 = arith.constant 0 : index
      %c0_102 = arith.constant 0 : index
      %197 = vector.load %arg5[%c1_100, %c0_101, %c0_102] : memref<2x4x128xf32, #tpu.memory_space<vmem>>, vector<1x4x128xf32>
      %198 = vector.shape_cast %197 : vector<1x4x128xf32> to vector<4x128xf32>
      %cst_103 = arith.constant dense<0.000000e+00> : vector<4x4xf32>
      %199 = tpu.matmul %178, %198, %cst_103 {dimension_numbers = #tpu.dot_dimension_numbers<[1], [1], [0], [0], [0, 0, 1, 0], [], []>} : vector<4x128xf32>, vector<4x128xf32>, vector<4x4xf32> -> vector<4x4xf32>
      %200 = vector.extract_strided_slice %133 {offsets = [1, 0], sizes = [1, 4], strides = [1, 1]} : vector<2x4xf32> to vector<1x4xf32>
      %201 = vector.broadcast %200 : vector<1x4xf32> to vector<4x4xf32>
      %202 = arith.cmpf ogt, %199, %201 : vector<4x4xf32>
      %cst_104 = arith.constant 0.000000e+00 : f32
      %203 = vector.broadcast %cst_104 : f32 to vector<4x4xf32>
      %204 = arith.select %202, %199, %203 : vector<4x4xi1>, vector<4x4xf32>
      %cst_105 = arith.constant 0.000000e+00 : f32
      %205 = vector.broadcast %cst_105 : f32 to vector<4x4xf32>
      %206 = arith.select %136, %204, %205 : vector<4x4xi1>, vector<4x4xf32>
      %cst_106 = arith.constant 1.000000e-01 : f32
      %207 = vector.broadcast %cst_106 : f32 to vector<4x4xf32>
      %208 = arith.subf %206, %207 : vector<4x4xf32>
      %cst_107 = arith.constant 3.200000e+01 : f32
      %209 = vector.broadcast %cst_107 : f32 to vector<4x4xf32>
      %210 = arith.mulf %209, %208 : vector<4x4xf32>
      %211 = math.exp %210 : vector<4x4xf32>
      %212 = vector.shape_cast %211 : vector<4x4xf32> to vector<1x4x4xf32>
      %cst_108 = arith.constant dense<0.000000e+00> : vector<1xf32>
      %213 = vector.multi_reduction <add>, %212, %cst_108 [1, 2] : vector<1x4x4xf32> to vector<1xf32>
      %214 = vector.shape_cast %213 : vector<1xf32> to vector<1x1x1xf32>
      %215 = vector.extract %214[0, 0, 0] : f32 from vector<1x1x1xf32>
      %216 = arith.addf %196, %215 : f32
      %cst_109 = arith.constant 1.000000e+00 : f32
      %217 = arith.addf %cst_109, %216 : f32
      %218 = math.log %217 : f32
      %cst_110 = arith.constant 4.000000e+00 : f32
      %219 = arith.divf %218, %cst_110 : f32
      %c0_111 = arith.constant 0 : index
      %c0_112 = arith.constant 0 : index
      %220 = vector.load %arg6[%c0_111, %c0_112] : memref<1x4xf32, #tpu.memory_space<vmem>>, vector<1x4xf32>
      %c0_113 = arith.constant 0 : index
      %c0_114 = arith.constant 0 : index
      %221 = vector.load %arg7[%c0_113, %c0_114] : memref<1x4xf32, #tpu.memory_space<vmem>>, vector<1x4xf32>
      %c0_115 = arith.constant 0 : index
      %c0_116 = arith.constant 0 : index
      %222 = vector.load %arg8[%c0_115, %c0_116] : memref<1x4xf32, #tpu.memory_space<vmem>>, vector<1x4xf32>
      %cst_117 = arith.constant 0.000000e+00 : f32
      %223 = vector.broadcast %cst_117 : f32 to vector<1x4xf32>
      %224 = arith.cmpf ogt, %222, %223 : vector<1x4xf32>
      %225 = arith.extui %224 : vector<1x4xi1> to vector<1x4xi32>
      %226 = arith.sitofp %225 : vector<1x4xi32> to vector<1x4xf32>
      %227 = vector.shape_cast %226 : vector<1x4xf32> to vector<1x1x4xf32>
      %cst_118 = arith.constant dense<0.000000e+00> : vector<1xf32>
      %228 = vector.multi_reduction <add>, %227, %cst_118 [1, 2] : vector<1x1x4xf32> to vector<1xf32>
      %229 = vector.shape_cast %228 : vector<1xf32> to vector<1x1x1xf32>
      %230 = vector.extract %229[0, 0, 0] : f32 from vector<1x1x1xf32>
      %cst_119 = arith.constant 0.000000e+00 : f32
      %231 = arith.cmpf ogt, %230, %cst_119 : f32
      %cst_120 = arith.constant 1.000000e+00 : f32
      %232 = arith.select %231, %230, %cst_120 : f32
      %cst_121 = arith.constant 1.000000e+00 : f32
      %233 = vector.broadcast %cst_121 : f32 to vector<1x4xf32>
      %234 = arith.addf %233, %220 : vector<1x4xf32>
      %235 = math.log %234 : vector<1x4xf32>
      %236 = vector.shape_cast %235 : vector<1x4xf32> to vector<1x1x4xf32>
      %cst_122 = arith.constant dense<0.000000e+00> : vector<1xf32>
      %237 = vector.multi_reduction <add>, %236, %cst_122 [1, 2] : vector<1x1x4xf32> to vector<1xf32>
      %238 = vector.shape_cast %237 : vector<1xf32> to vector<1x1x1xf32>
      %239 = vector.extract %238[0, 0, 0] : f32 from vector<1x1x1xf32>
      %240 = arith.divf %239, %232 : f32
      %cst_123 = arith.constant 1.000000e+00 : f32
      %241 = vector.broadcast %cst_123 : f32 to vector<1x4xf32>
      %242 = arith.addf %241, %221 : vector<1x4xf32>
      %243 = math.log %242 : vector<1x4xf32>
      %244 = vector.shape_cast %243 : vector<1x4xf32> to vector<1x1x4xf32>
      %cst_124 = arith.constant dense<0.000000e+00> : vector<1xf32>
      %245 = vector.multi_reduction <add>, %244, %cst_124 [1, 2] : vector<1x1x4xf32> to vector<1xf32>
      %246 = vector.shape_cast %245 : vector<1xf32> to vector<1x1x1xf32>
      %247 = vector.extract %246[0, 0, 0] : f32 from vector<1x1x1xf32>
      %cst_125 = arith.constant 4.000000e+00 : f32
      %248 = arith.divf %247, %cst_125 : f32
      %249 = arith.addf %240, %248 : f32
      %250 = arith.addf %249, %219 : f32
      %c0_126 = arith.constant 0 : index
      %c0_127 = arith.constant 0 : index
      %251 = memref.load %arg4[%c0_126, %c0_127] : memref<1x1xf32, #tpu.memory_space<smem>>
      memref.store %250, %arg4[%c0_126, %c0_127] : memref<1x1xf32, #tpu.memory_space<smem>>
    } else {
    }
    return
  }
  func.func @transform_0(%arg0: i32) -> (i32, i32) {
    %c0_i32 = arith.constant 0 : i32
    %c0_i32_0 = arith.constant 0 : i32
    return %arg0, %c0_i32 : i32, i32
  }
  func.func @transform_1(%arg0: i32) -> (i32, i32) {
    %c0_i32 = arith.constant 0 : i32
    %c0_i32_0 = arith.constant 0 : i32
    return %arg0, %c0_i32 : i32, i32
  }
  func.func @transform_2(%arg0: i32) -> (i32, i32, i32) {
    %c0_i32 = arith.constant 0 : i32
    %c0_i32_0 = arith.constant 0 : i32
    %c0_i32_1 = arith.constant 0 : i32
    %c0_i32_2 = arith.constant 0 : i32
    return %c0_i32, %c0_i32_0, %c0_i32_1 : i32, i32, i32
  }
  func.func @transform_3(%arg0: i32) -> (i32, i32) {
    %c0_i32 = arith.constant 0 : i32
    %c0_i32_0 = arith.constant 0 : i32
    %c0_i32_1 = arith.constant 0 : i32
    return %c0_i32, %c0_i32_0 : i32, i32
  }
}

</mosaic_0001>

<bundles_post_ra>
// kernel: multi_proxy_loss.1
= control target key start
LH: loop header
LB: loop body
LE: loop exit
PB: predicated region body
PF: predicated region fallthrough
CT: control target
= control target key end

     0   :  { %vm23_vm0 = vcmask 1043456   ;;  %s1031_s0 = inlined_call_operand.vmem [shape: s32[8,1], index: 0, kind: input, shape index: {}]   ;;  %s1032_s1 = inlined_call_operand.vmem [shape: f32[8,128], index: 1, kind: input, shape index: {}]   ;;  %s1033_s2 = inlined_call_operand.vmem [shape: f32[2,4,128], index: 2, kind: input, shape index: {}]   ;;  %s1034_s3 = inlined_call_operand.hbm [shape: f32[1,1], index: 3, kind: output, shape index: {}]  }
   0x1   :  { %v19_v0 = vld [vmem:[%s1033_s2] sm:$0xf]  ;;  %v20_v1 = vld [vmem:[%s1033_s2 + $0x4] sm:$0xf] }
   0x2   :  { %v46_v2 = vld [vmem:[%s1032_s1] sm:$0xff]  ;;  %v21_v3 = vmul.f32 %v19_v0, %v19_v0  ;;  %v22_v4 = vmul.f32 %v20_v1, %v20_v1 }
   0x3   :  { %v47_v5 = vmul.f32 %v46_v2, %v46_v2 }
   0x4   :  { %8 = vsyncpa [#allocation8], 0  ;;  %v24_v6 = vsel %vm23_vm0, %v21_v3, 0.0  ;;  %v27_v7 = vsel %vm23_vm0, %v22_v4, 0.0  ;;  %v886_v8 = vmov 0.0   ;;  %vm887_vm1 = vmmov 0  }
   0x5   :  { %48 = vadd.xlane.f32.xlu1 %v47_v5  ;;  %25 = vadd.xlane.f32.xlu0 %v24_v6  ;;  %v53_v9 = vld [vmem:[%s1031_s0] sm:$0xff]  ;;  %v888_v10 = vmov 0   ;;  %vm38_vm3 = vcmask 24576   ;;  %vm42_vm4 = vcmask 25600   ;;  %v889_v28 = vmov -1e+30  }
   0x6   :  { %781 = vmatprep.subr.mxu0 %v886_v8  ;;  %786 = vmatprep.subr.mxu1 %v886_v8  ;;  %vm54_vm2 = vcmp.ge.s32.totalorder %v53_v9, 0  ;;  %39 = vst.msk [vmem:[#allocation3] sm:$0x1] %vm38_vm3, %v886_v8  ;;  %41 = vst.msk [vmem:[#allocation5] sm:$0x1] %vm38_vm3, %v886_v8  ;;  %v55_v29 = vlaneseq  ;;  %vm254_vm7 = vcmask 31744  }
   0x7   :  { %783 = vmatprep.mubr.msk.f32.mxu0 %vm887_vm1, %v886_v8  ;;  %788 = vmatprep.mubr.msk.f32.mxu1 %vm887_vm1, %v886_v8  ;;  %v248_v11 = vsel %vm54_vm2, 1, %v888_v10  ;;  %40 = vst.msk [vmem:[#allocation4] sm:$0x1] %vm38_vm3, %v886_v8  ;;  %vm890_vm2 = vmmov 1   ;;  %s874_s10 = scalar_lea.hbm %s1034_s3, 16 }
   0x8   :  { %837 = vset.pattern.permute.xlu0 %v888_v10  ;;  %836 = vset.pattern.permute.xlu1 %v888_v10  ;;  %43 = vst.msk [vmem:[#allocation6] sm:$0x3] %vm42_vm4, %v889_v28  ;;  %v949_v30 = vand.u32 127, %v55_v29  ;;  %v951_v31 = vshrl.u32 %v55_v29, 7  ;;  %p875_p1 = scmp.ne.s32.totalorder %s1034_s3, %s874_s10  ;;  %p878_p2 = scmp.lt.u32.totalorder %s874_s10, %s1034_s3 }
   0x9   :  { %28 = vadd.xlane.f32.xlu0 %v27_v7 }
   0xa   :  { %vm321_vm5 = vcmp.ne.s32.totalorder %v951_v31, %v949_v30  ;;  %p880_p3 = pnand %p878_p2, %p875_p1 }
   0xd   :  { %v303_v40 = vld [vmem:[#allocation5] sm:$0x1] }
  0x16   :  { %250 = vperm.xlu1 %836, %v248_v11  }
  0x1f   :  { %58 = vperm.xlu0 %837, %v53_v9  }
  0x92   :  { %v26_v12 = vpop.xlane.xlu0 %25  ;;  %v49_v14 = vpop.xlane.xlu1 %48 }
  0x93   :  { %v30_v13 = vadd.f32 1e-12, %v26_v12  ;;  %v50_v17 = vadd.f32 1e-12, %v49_v14 }
  0x95   :  { %838 = vrsqrt.f32 %v30_v13 }
  0x96   :  { %v29_v15 = vpop.xlane.xlu0 %28 }
  0x97   :  { %v31_v16 = vadd.f32 1e-12, %v29_v15 }
  0x99   :  { %840 = vrsqrt.f32 %v31_v16 }
  0x9a   :  { %842 = vrsqrt.f32 %v50_v17 }
  0x9e   :  { %v955_v32 = vpop.permute.xlu0 %58 }
  0x9f   :  { %v839_v18 = vpop.eup %838  ;;  %vm60_vm6 = vcmp.eq.s32.totalorder %v955_v32, %v949_v30 }
  0xa0   :  { %v34_v19 = vmul.f32 %v839_v18, %v19_v0  ;;  %v763_v33 = vsel %vm60_vm6, 1.0, %v886_v8 }
  0xa1   :  { %v306_v34 = vsel %vm254_vm7, %v763_v33, 0.0 }
  0xa2   :  { %36 = vst [vmem:[#allocation2] sm:$0xf] %v34_v19  ;;  %v307_v35 = vrot.slane %v306_v34, 4 }
  0xa3   :  { %v841_v20 = vpop.eup %840 }
  0xa4   :  { %v35_v21 = vmul.f32 %v841_v20, %v20_v1  ;;  %v843_v22 = vpop.eup %842  ;;  %v308_v36 = vadd.f32 %v307_v35, %v306_v34  ;;  %v973_v1 = vpop.permute.xlu1 %250 }
  0xa5   :  { %v52_v24 = vmul.f32 %v843_v22, %v46_v2  ;;  %vm252_vm12 = vcmp.eq.s32.totalorder %v973_v1, 1 }
  0xa6   :  { %37 = vst [vmem:[#allocation2 + $0x4] sm:$0xf] %v35_v21  ;;  %v309_v37 = vrot.slane %v308_v36, 2 }
  0xa8   :  { %v310_v38 = vadd.f32 %v309_v37, %v308_v36 }
  0xa9   :  { %v61_v23 = vld [vmem:[#allocation2] sm:$0xf] }
  0xaa   :  { %782 = vmatpush3.xpose.msra.mxu0 %v61_v23  ;;  %v322_v26 = vld [vmem:[#allocation2] sm:$0xf]  ;;  %v311_v39 = vrot.slane %v310_v38, 1 }
  0xab   :  { %791 = vmatprep.subr.mxu0 %v886_v8 }
  0xac   :  { %v312_v41 = vadd.f32 %v311_v39, %v310_v38 }
  0xad   :  { %784 = vmatmul.mubr.f32.vlgmr.msra.gmra.mrb[0].mxu0 %v52_v24  ;;  %v133_v25 = vld [vmem:[#allocation2 + $0x4] sm:$0xf] }
  0xae   :  { %787 = vmatpush3.xpose.msra.mxu1 %v133_v25  ;;  %792 = vmatpush3.xpose.msra.mxu0 %v322_v26  ;;  %v416_v27 = vld [vmem:[#allocation2 + $0x4] sm:$0xf]  ;;  %v313_v42 = vadd.f32 %v312_v41, %v303_v40 }
  0xaf   :  { %793 = vmatprep.mubr.msk.f32.mxu0 %vm887_vm1, %v886_v8  ;;  %796 = vmatprep.subr.mxu1 %v886_v8 }
  0xb0   :  { %801 = vmatprep.subr.mxu0 %v886_v8  ;;  %314 = vst.msk [vmem:[#allocation5] sm:$0x1] %vm38_vm3, %v313_v42 }
  0xb1   :  { %789 = vmatmul.mubr.f32.vlgmr.msra.gmra.mrb[0].mxu1 %v52_v24  ;;  %794 = vmatmul.mubr.f32.vlgmr.msra.gmra.mrb[2].mxu0 %v322_v26 }
  0xb2   :  { %797 = vmatpush3.xpose.msra.mxu1 %v416_v27  ;;  %802 = vmatpush3.xpose.msra.mxu0 %v322_v26 }
  0xb3   :  { %798 = vmatprep.mubr.msk.f32.mxu1 %vm887_vm1, %v886_v8  ;;  %803 = vmatprep.mubr.msk.f32.mxu0 %vm887_vm1, %v886_v8 }
  0xb4   :  { %806 = vmatprep.subr.mxu1 %v886_v8 }
  0xb5   :  { %799 = vmatmul.mubr.f32.vlgmr.msra.gmra.mrb[2].mxu1 %v322_v26  ;;  %804 = vmatmul.mubr.f32.vlgmr.msra.gmra.mrb[4].mxu0 %v416_v27 }
  0xb6   :  { %807 = vmatpush3.xpose.msra.mxu1 %v416_v27  ;;  %808 = vmatprep.mubr.msk.f32.mxu1 %vm887_vm1, %v886_v8  ;;  %vm272_vm1 = vcmask 1040384  }
  0xb9   :  { %809 = vmatmul.mubr.f32.vlgmr.msra.gmra.mrb[4].mxu1 %v416_v27 }
 0x180   :  { %v128_v43 = vpop.f32.mrb[0].mxu0 }
 0x181   :  { %v204_v44 = vmul.f32 1.442695, %v128_v43  ;;  %v785_v45 = vpop.f32.mrb[1].mxu0 }
 0x183   :  { %844 = vpow2.f32 %v204_v44  ;;  %v274_v44 = vld [vmem:[#allocation6] sm:$0x3] }
 0x184   :  { %v200_v46 = vpop.f32.mrb[0].mxu1  ;;  %v965_v47 = vpop.f32.mrb[2].mxu0 }
 0x185   :  { %v206_v48 = vmul.f32 1.442695, %v200_v46  ;;  %v790_v49 = vpop.f32.mrb[1].mxu1  ;;  %v795_v50 = vpop.f32.mrb[3].mxu0 }
 0x187   :  { %846 = vpow2.f32 %v206_v48 }
 0x188   :  { %v967_v51 = vpop.f32.mrb[2].mxu1  ;;  %v969_v52 = vpop.f32.mrb[4].mxu0 }
 0x189   :  { %v800_v53 = vpop.f32.mrb[3].mxu1  ;;  %v805_v54 = vpop.f32.mrb[5].mxu0 }
 0x18c   :  { %v971_v55 = vpop.f32.mrb[4].mxu1 }
 0x18d   :  { %v810_v56 = vpop.f32.mrb[5].mxu1  ;;  %v845_v57 = vpop.eup %844 }
 0x191   :  { %v847_v58 = vpop.eup %846 }
 0x192   :  { %v208_v59 = vadd.f32 %v847_v58, %v845_v57 }
 0x194   :  { %848 = vrcp.f32 %v208_v59 }
 0x19e   :  { %v849_v60 = vpop.eup %848 }
 0x19f   :  { %v212_v61 = vmul.f32 %v849_v60, %v847_v58  ;;  %v211_v62 = vmul.f32 %v849_v60, %v845_v57 }
 0x1a1   :  { %vm219_vm8 = vcmp.gt.f32.partialorder %v212_v61, 0.008333334  ;;  %vm213_vm9 = vcmp.gt.f32.partialorder %v211_v62, 0.008333334  ;;  %vm227_vm10 = vcmp.le.f32.partialorder %v211_v62, 0.008333334 }
 0x1a2   :  { %v220_v63 = vsel %vm219_vm8, %v200_v46, 0.0  ;;  %v214_v0 = vsel %vm213_vm9, %v128_v43, 0.0  ;;  %v228_v2 = vsel %vm227_vm10, %v128_v43, 0.0  ;;  %vm229_vm11 = vcmp.le.f32.partialorder %v212_v61, 0.008333334  ;;  %vm291_vm8 = vmxor %vm60_vm6, %vm890_vm2 }
 0x1a3   :  { %v760_v3 = vadd.f32 -0.1, %v220_v63  ;;  %v759_v4 = vadd.f32 -0.1, %v214_v0  ;;  %v230_v5 = vsel %vm229_vm11, %v200_v46, 0.0  ;;  %vm292_vm9 = vmand %vm291_vm8, %vm252_vm12  ;;  %v395_v61 = vsub.s32 0, %v951_v31 }
 0x1a4   :  { %v231_v6 = vmax.f32 %v228_v2, %v230_v5  ;;  %v489_v62 = vsub.s32 1, %v951_v31  ;;  %vm404_vm11 = vcmask 27648  }
 0x1a5   :  { %v222_v7 = vmul.f32 -32.0, %v760_v3  ;;  %v216_v9 = vmul.f32 -32.0, %v759_v4 }
 0x1a6   :  { %vm232_vm13 = vcmp.gt.f32.partialorder %v128_v43, %v231_v6  ;;  %vm238_vm14 = vcmp.gt.f32.partialorder %v200_v46, %v231_v6  ;;  %vm246_vm15 = vcmp.le.f32.partialorder %v128_v43, %v231_v6  ;;  %vm262_vm0 = vcmp.le.f32.partialorder %v200_v46, %v231_v6 }
 0x1a7   :  { %v217_v10 = vmul.f32 1.442695, %v216_v9  ;;  %v223_v11 = vmul.f32 1.442695, %v222_v7  ;;  %v233_v12 = vsel %vm232_vm13, %v128_v43, 0.0  ;;  %v239_v13 = vsel %vm238_vm14, %v200_v46, 0.0 }
 0x1a8   :  { %v761_v14 = vadd.f32 -0.1, %v233_v12  ;;  %v762_v15 = vadd.f32 -0.1, %v239_v13  ;;  %v247_v16 = vsel %vm246_vm15, %v128_v43, 0.0  ;;  %v263_v17 = vsel %vm262_vm0, %v200_v46, 0.0 }
 0x1a9   :  { %850 = vpow2.f32 %v217_v10  ;;  %v253_v18 = vsel %vm252_vm12, %v247_v16, -1e+30  ;;  %v264_v19 = vsel %vm252_vm12, %v263_v17, -1e+30  ;;  %v278_v9 = vld [vmem:[#allocation3] sm:$0x1] }
 0x1aa   :  { %852 = vpow2.f32 %v223_v11  ;;  %v235_v20 = vmul.f32 32.0, %v761_v14  ;;  %v241_v21 = vmul.f32 32.0, %v762_v15  ;;  %v255_v22 = vsel %vm254_vm7, %v253_v18, -inf }
 0x1ab   :  { %v256_v23 = vrot.slane %v255_v22, 4  ;;  %v265_v24 = vsel %vm254_vm7, %v264_v19, -inf }
 0x1ac   :  { %v236_v25 = vmul.f32 1.442695, %v235_v20  ;;  %v242_v26 = vmul.f32 1.442695, %v241_v21  ;;  %v266_v27 = vrot.slane %v265_v24, 4 }
 0x1ad   :  { %v257_v28 = vmax.f32 %v255_v22, %v256_v23  ;;  %v290_v21 = vld [vmem:[#allocation4] sm:$0x1] }
 0x1ae   :  { %854 = vpow2.f32 %v236_v25  ;;  %v267_v29 = vmax.f32 %v265_v24, %v266_v27 }
 0x1af   :  { %856 = vpow2.f32 %v242_v26  ;;  %v258_v33 = vrot.slane %v257_v28, 2 }
 0x1b0   :  { %v268_v34 = vrot.slane %v267_v29, 2 }
 0x1b1   :  { %v259_v35 = vmax.f32 %v257_v28, %v258_v33 }
 0x1b2   :  { %v269_v36 = vmax.f32 %v267_v29, %v268_v34 }
 0x1b3   :  { %v851_v37 = vpop.eup %850  ;;  %v260_v38 = vrot.slane %v259_v35, 1 }
 0x1b4   :  { %v853_v39 = vpop.eup %852  ;;  %v270_v40 = vrot.slane %v269_v36, 1 }
 0x1b5   :  { %v225_v41 = vadd.f32 %v853_v39, %v851_v37  ;;  %v261_v42 = vmax.f32 %v259_v35, %v260_v38 }
 0x1b6   :  { %v271_v43 = vmax.f32 %v269_v36, %v270_v40 }
 0x1b7   :  { %v226_v45 = vmul.f32 0.5, %v225_v41  ;;  %v693_v41 = vld [vmem:[#allocation5] sm:$0x1] }
 0x1b8   :  { %v855_v46 = vpop.eup %854  ;;  %v273_v48 = vsel %vm272_vm1, %v261_v42, %v271_v43 }
 0x1b9   :  { %v857_v49 = vpop.eup %856  ;;  %v279_v50 = vsel %vm60_vm6, %v226_v45, 0.0  ;;  %v275_v53 = vmax.f32 %v274_v44, %v273_v48 }
 0x1ba   :  { %v280_v54 = vsel %vm254_vm7, %v279_v50, 0.0  ;;  %v244_v56 = vadd.f32 %v857_v49, %v855_v46 }
 0x1bb   :  { %v281_v57 = vrot.slane %v280_v54, 4  ;;  %277 = vst.msk [vmem:[#allocation6] sm:$0x3] %vm42_vm4, %v275_v53 }
 0x1bc   :  { %v245_v58 = vmul.f32 0.5, %v244_v56 }
 0x1bd   :  { %v282_v59 = vadd.f32 %v281_v57, %v280_v54 }
 0x1be   :  { %v293_v60 = vsel %vm292_vm9, %v245_v58, 0.0 }
 0x1bf   :  { %v283_v63 = vrot.slane %v282_v59, 2  ;;  %v294_v0 = vsel %vm254_vm7, %v293_v60, 0.0 }
 0x1c0   :  { %v295_v2 = vrot.slane %v294_v0, 4 }
 0x1c1   :  { %v284_v32 = vadd.f32 %v283_v63, %v282_v59 }
 0x1c2   :  { %v296_v3 = vadd.f32 %v295_v2, %v294_v0  ;;  %v318_v4 = vld [vmem:[#allocation6] sm:$0x3] }
 0x1c3   :  { %v285_v5 = vrot.slane %v284_v32, 1  ;;  %v396_v6 = vrot.slane %v318_v4, %v395_v61  ;;  %v490_v7 = vrot.slane %v318_v4, %v489_v62 }
 0x1c4   :  { %v297_v10 = vrot.slane %v296_v3, 2 }
 0x1c5   :  { %v286_v11 = vadd.f32 %v285_v5, %v284_v32  ;;  %vm578_vm4 = vcmp.gt.f32.partialorder %v969_v52, %v396_v6  ;;  %vm491_vm6 = vcmp.gt.f32.partialorder %v967_v51, %v490_v7  ;;  %vm397_vm10 = vcmp.gt.f32.partialorder %v965_v47, %v396_v6 }
 0x1c6   :  { %v298_v1 = vadd.f32 %v297_v10, %v296_v3  ;;  %v579_v12 = vsel %vm578_vm4, %v969_v52, 0.0  ;;  %v492_v13 = vsel %vm491_vm6, %v967_v51, 0.0  ;;  %v398_v14 = vsel %vm397_vm10, %v965_v47, 0.0 }
 0x1c7   :  { %v287_v15 = vadd.f32 %v286_v11, %v278_v9  ;;  %v766_v16 = vadd.f32 -0.1, %v579_v12  ;;  %v765_v17 = vadd.f32 -0.1, %v492_v13  ;;  %v399_v18 = vsel %vm321_vm5, %v398_v14, 0.0 }
 0x1c8   :  { %v299_v19 = vrot.slane %v298_v1, 1  ;;  %v764_v20 = vadd.f32 -0.1, %v399_v18  ;;  %vm665_vm7 = vcmp.gt.f32.partialorder %v971_v55, %v490_v7 }
 0x1c9   :  { %289 = vst.msk [vmem:[#allocation3] sm:$0x1] %vm38_vm3, %v287_v15  ;;  %v581_v22 = vmul.f32 32.0, %v766_v16  ;;  %v494_v52 = vmul.f32 32.0, %v765_v17  ;;  %v666_v51 = vsel %vm665_vm7, %v971_v55, 0.0 }
 0x1ca   :  { %v300_v23 = vadd.f32 %v299_v19, %v298_v1  ;;  %v401_v47 = vmul.f32 32.0, %v764_v20  ;;  %v667_v24 = vsel %vm321_vm5, %v666_v51, 0.0  ;;  %vm694_vm5 = vcmp.gt.f32.partialorder %v693_v41, 0.0 }
 0x1cb   :  { %v582_v25 = vmul.f32 1.442695, %v581_v22  ;;  %v495_v26 = vmul.f32 1.442695, %v494_v52  ;;  %v767_v27 = vadd.f32 -0.1, %v667_v24 }
 0x1cc   :  { %v301_v28 = vadd.f32 %v300_v23, %v290_v21  ;;  %v402_v29 = vmul.f32 1.442695, %v401_v47  ;;  %v768_v44 = vsel %vm694_vm5, 1.0, %v886_v8 }
 0x1cd   :  { %858 = vpow2.f32 %v582_v25  ;;  %v669_v33 = vmul.f32 32.0, %v767_v27  ;;  %v697_v48 = vsel %vm38_vm3, %v768_v44, 0.0 }
 0x1ce   :  { %302 = vst.msk [vmem:[#allocation4] sm:$0x1] %vm38_vm3, %v301_v28  ;;  %860 = vpow2.f32 %v495_v26 }
 0x1cf   :  { %862 = vpow2.f32 %v402_v29  ;;  %v670_v34 = vmul.f32 1.442695, %v669_v33 }
 0x1d0   :  { %v691_v35 = vld [vmem:[#allocation3] sm:$0x1] }
 0x1d1   :  { %864 = vpow2.f32 %v670_v34  ;;  %v709_v55 = vadd.f32 1.0, %v691_v35 }
 0x1d3   :  { %866 = vlog2.f32 %v709_v55 }
 0x1d5   :  { %v692_v36 = vld [vmem:[#allocation4] sm:$0x1] }
 0x1d6   :  { %v726_v30 = vadd.f32 1.0, %v692_v36 }
 0x1d7   :  { %v859_v37 = vpop.eup %858 }
 0x1d8   :  { %v861_v31 = vpop.eup %860  ;;  %v584_v38 = vsel %vm404_vm11, %v859_v37, 0.0  ;;  %868 = vlog2.f32 %v726_v30 }
 0x1d9   :  { %v863_v39 = vpop.eup %862  ;;  %585 = vadd.xlane.f32.xlu1 %v584_v38  ;;  %v497_v40 = vsel %vm404_vm11, %v861_v31, 0.0 }
 0x1da   :  { %498 = vadd.xlane.f32.xlu0 %v497_v40  ;;  %v405_v42 = vsel %vm404_vm11, %v863_v39, 0.0 }
 0x1db   :  { %v865_v43 = vpop.eup %864 }
 0x1dc   :  { %v672_v45 = vsel %vm404_vm11, %v865_v43, 0.0 }
 0x1dd   :  { %406 = vadd.xlane.f32.xlu1 %v405_v42  ;;  %v867_v46 = vpop.eup %866 }
 0x1de   :  { %v711_v49 = vmul.f32 0.6931472, %v867_v46 }
 0x1e0   :  { %v712_v53 = vsel %vm38_vm3, %v711_v49, 0.0 }
 0x1e1   :  { %673 = vadd.xlane.f32.xlu1 %v672_v45 }
 0x1e2   :  { %v869_v50 = vpop.eup %868 }
 0x1e3   :  { %v728_v54 = vmul.f32 0.6931472, %v869_v50 }
 0x1e5   :  { %698 = vadd.xlane.f32.xlu1 %v697_v48  ;;  %v729_v56 = vsel %vm38_vm3, %v728_v54, 0.0 }
 0x1e9   :  { %713 = vadd.xlane.f32.xlu1 %v712_v53 }
 0x1ed   :  { %730 = vadd.xlane.f32.xlu1 %v729_v56 }
 0x266   :  { %v586_v57 = vpop.xlane.xlu1 %585 }
 0x267   :  { %v587_v58 = vrot.slane %v586_v57, 4  ;;  %v499_v59 = vpop.xlane.xlu0 %498 }
 0x268   :  { %v500_v8 = vrot.slane %v499_v59, 4 }
 0x269   :  { %v588_v60 = vadd.f32 %v587_v58, %v586_v57 }
 0x26a   :  { %v501_v61 = vadd.f32 %v500_v8, %v499_v59  ;;  %v407_v62 = vpop.xlane.xlu1 %406 }
 0x26b   :  { %v589_v63 = vrot.slane %v588_v60, 2  ;;  %v408_v0 = vrot.slane %v407_v62, 4 }
 0x26c   :  { %v502_v2 = vrot.slane %v501_v61, 2 }
 0x26d   :  { %v409_v32 = vadd.f32 %v408_v0, %v407_v62  ;;  %v590_v7 = vadd.f32 %v589_v63, %v588_v60 }
 0x26e   :  { %v503_v3 = vadd.f32 %v502_v2, %v501_v61  ;;  %v674_v4 = vpop.xlane.xlu1 %673 }
 0x26f   :  { %v410_v5 = vrot.slane %v409_v32, 2  ;;  %v675_v6 = vrot.slane %v674_v4, 4  ;;  %v591_v13 = vrot.slane %v590_v7, 1 }
 0x270   :  { %v504_v11 = vrot.slane %v503_v3, 1 }
 0x271   :  { %v676_v9 = vadd.f32 %v675_v6, %v674_v4  ;;  %v411_v10 = vadd.f32 %v410_v5, %v409_v32  ;;  %v592_v17 = vadd.f32 %v591_v13, %v590_v7 }
 0x272   :  { %v505_v16 = vadd.f32 %v504_v11, %v503_v3  ;;  %v699_v20 = vpop.xlane.xlu1 %698 }
 0x273   :  { %v677_v1 = vrot.slane %v676_v9, 2  ;;  %v412_v12 = vrot.slane %v411_v10, 1  ;;  %v700_v22 = vrot.slane %v699_v20, 4 }
 0x275   :  { %v413_v14 = vadd.f32 %v412_v12, %v411_v10  ;;  %v678_v15 = vadd.f32 %v677_v1, %v676_v9  ;;  %v701_v51 = vadd.f32 %v700_v22, %v699_v20 }
 0x276   :  { %v714_v21 = vpop.xlane.xlu1 %713 }
 0x277   :  { %811 = vpush %v413_v14  ;;  %v679_v18 = vrot.slane %v678_v15, 1  ;;  %v715_v52 = vrot.slane %v714_v21, 4  ;;  %v702_v24 = vrot.slane %v701_v51, 2 }
 0x278   :  { %813 = vpush %v505_v16 }
 0x279   :  { %815 = vpush %v592_v17  ;;  %v680_v19 = vadd.f32 %v679_v18, %v678_v15  ;;  %v716_v23 = vadd.f32 %v715_v52, %v714_v21  ;;  %v703_v26 = vadd.f32 %v702_v24, %v701_v51 }
 0x27a   :  { %v731_v36 = vpop.xlane.xlu1 %730 }
 0x27b   :  { %817 = vpush %v680_v19  ;;  %v717_v25 = vrot.slane %v716_v23, 2  ;;  %v704_v28 = vrot.slane %v703_v26, 1  ;;  %v732_v37 = vrot.slane %v731_v36, 4 }
 0x27d   :  { %v718_v27 = vadd.f32 %v717_v25, %v716_v23  ;;  %v705_v35 = vadd.f32 %v704_v28, %v703_v26  ;;  %v733_v30 = vadd.f32 %v732_v37, %v731_v36 }
 0x27f   :  { %v719_v29 = vrot.slane %v718_v27, 1  ;;  %v734_v31 = vrot.slane %v733_v30, 2 }
 0x281   :  { %v720_v55 = vadd.f32 %v719_v29, %v718_v27  ;;  %v735_v39 = vadd.f32 %v734_v31, %v733_v30 }
 0x283   :  { %v736_v40 = vrot.slane %v735_v39, 1 }
 0x285   :  { %v737_v42 = vadd.f32 %v736_v40, %v735_v39 }
 0x2a8   :  { %s812_s0 = spop %811 }
 0x2a9   :  { %s814_s18 = spop %813 }
 0x2aa   :  { %s507_s19 = sadd.f32 %s814_s18, %s812_s0  ;;  %s816_s20 = spop %815 }
 0x2ac   :  { %s594_s21 = sadd.f32 %s816_s20, %s507_s19  ;;  %s818_s22 = spop %817 }
 0x2ae   :  { %s682_s23 = sadd.f32 %s818_s22, %s594_s21 }
 0x2b0   :  { %s683_s24 = sadd.f32 1.0, %s682_s23 }
 0x2b2   :  { %v684_v47 = vstv %s683_s24 }
 0x2b3   :  { %870 = vlog2.f32 %v684_v47 }
 0x2bd   :  { %v871_v33 = vpop.eup %870 }
 0x2be   :  { %v686_v34 = vmul.f32 0.6931472, %v871_v33 }
 0x2c0   :  { %819 = vpush %v686_v34 }
 0x2c1   :  { %821 = vpush %v705_v35 }
 0x2c2   :  { %823 = vpush %v720_v55 }
 0x2f1   :  { %s820_s25 = spop %819 }
 0x2f2   :  { %s822_s26 = spop %821  ;;  %s690_s5 = smul.f32 0.25, %s820_s25 }
 0x2f3   :  { %p707_p0 = scmp.gt.f32.partialorder %s822_s26, 0.0  ;;  %s824_s27 = spop %823 }
 0x2f5   :  { %s1036_s26 = smov (!%p707_p0, %s822_s26), 1.0 }
 0x2f6   :  { %v722_v38 = vstv %s1036_s26 }
 0x2f7   :  { %872 = vrcp.f32 %v722_v38 }
 0x301   :  { %v873_v41 = vpop.eup %872 }
 0x302   :  { %825 = vpush %v873_v41 }
 0x303   :  { %827 = vpush %v737_v42 }
 0x333   :  { %s826_s28 = spop %825 }
 0x334   :  { %s725_s29 = smul.f32 %s826_s28, %s824_s27  ;;  %s828_s30 = spop %827 }
 0x335   :  { %s741_s4 = smul.f32 0.25, %s828_s30 }
 0x337   :  { %s742_s6 = sadd.f32 %s741_s4, %s725_s29 }
 0x339   :  { %s743_s7 = sadd.f32 %s742_s6, %s690_s5 }
 0x33b   :  { %745 = sst [smem:[#allocation7]] %s743_s7 }
 0x33c   :  { %883 = shalt.err (!%p880_p3)
}
 0x33d   :  { %s891_s15 = smov [#allocation7]  }
 0x33e   :  { %753 = dma.smem_to_hbm %s891_s15, 16, %s1034_s3, [#allocation8]  }
 0x33f   :  { %884 = dma.done.wait [#allocation8], 16  }
 0x340   :  { %885 = vsyncadd [#allocation8], 4294967280 }
 0x341   :  { %757 = sfence }
 0x342   :  { %758 = vsyncpa [#allocation8], 1 }

</bundles_post_ra>
